<compile_context>
chip_gen: v5e
topology: v5e:2x2
jax: 0.10.0
libtpu: 0.0.40
codegen_flags: <defaults>
</compile_context>

<pallas_src>
import jax
import jax.numpy as jnp
from jax.experimental import pallas as pl
from jax.experimental.pallas import tpu as pltpu

N_OUT = 7            # nn.Linear(hidden, 7)
TM_CAP = 2048        # row tiles beyond this are already >85% of HBM roofline
VMEM_FRACTION = 0.85
HEADROOM = 4 << 20   # compiler-internal scratch / layout-padding slack


def _round_up(x, m):
    return ((x + m - 1) // m) * m


def _lane_pad(n):
    # Physical lane occupancy in VMEM: last dim is padded to 128 lanes.
    return _round_up(n, 128)


def _vmem_capacity_bytes():
    try:
        return int(pltpu.get_tpu_info().vmem_capacity_bytes)
    except Exception:
        return 64 << 20  # conservative fallback: v7x per-TensorCore VMEM


def _linear_kernel(x_ref, w_ref, b_ref, o_ref):
    # x_ref: (TM, H)   w_ref: (H, NP)   b_ref: (1, NP)   o_ref: (TM, NP)
    acc = jnp.dot(x_ref[...], w_ref[...], preferred_element_type=jnp.float32)
    o_ref[...] = (acc + b_ref[...]).astype(o_ref.dtype)


def properties_prediction(x, w_t, b):
    """
    x   : [batch, seq, hidden]  (f32 or bf16)
    w_t : [hidden, 7]           (transpose of the PyTorch weight [7, hidden])
    b   : [7]
    returns: [batch, seq, 7], same dtype as x
    """
    B, S, H = x.shape
    M = B * S
    x2d = x.reshape(M, H)                     # free: contiguous reshape, no copy

    itemsize = jnp.dtype(x.dtype).itemsize
    row_mult = max(8, 32 // itemsize)         # 8 rows (f32) / 16 rows (bf16)

    # Output width: lane-dense 128 only when H is large enough that the extra
    # output traffic (and the wrapper slice pass) is negligible.  Otherwise
    # emit the true 7-wide output and skip all output padding/slicing.
    lane_dense = H >= 1024
    NP = 128 if lane_dense else N_OUT

    w_p = w_t.astype(x.dtype)                 # NOTE: bf16 x demotes W to bf16 (f32 accum)
    b_p = b.astype(jnp.float32).reshape(1, N_OUT)
    if lane_dense:
        w_p = jnp.pad(w_p, ((0, 0), (0, NP - N_OUT)))
        b_p = jnp.pad(b_p, ((0, 0), (0, NP - N_OUT)))

    # ---- derive TM from the per-chip VMEM budget.  Never clamp the VMEM
    # limit below the real footprint: shrink TM instead.
    budget = int(_vmem_capacity_bytes() * VMEM_FRACTION)
    w_bytes = 2 * _round_up(H, 8) * _lane_pad(NP) * itemsize   # default double-buffered
    b_bytes = 2 * 8 * _lane_pad(NP) * 4
    per_row = 2 * _lane_pad(H) * itemsize + 2 * _lane_pad(NP) * itemsize
    avail = budget - HEADROOM - w_bytes - b_bytes
    tm_fit = (avail // per_row) // row_mult * row_mult if avail > 0 else 0
    # TODO(synk): for extreme H where even row_mult rows blow VMEM, add a K
    # ("arbitrary") grid axis with an f32 accumulator instead of a tiny TM.
    tm_fit = max(row_mult, tm_fit)

    TM = min(TM_CAP, tm_fit, _round_up(M, row_mult))
    if TM > M:
        TM = M                                 # single block == full dim (legal)

    # Give v7x's second TensorCore something to do: >= 2 grid steps when M allows.
    if -(-M // TM) < 2 and M > row_mult:
        TM = _round_up(-(-M // 2), row_mult)

    grid_m = -(-M // TM)   # ceil; ragged last tile handled by Pallas partial blocks

    footprint = (w_bytes + b_bytes
                 + 2 * TM * _lane_pad(H) * itemsize      # x, double-buffered
                 + 2 * TM * _lane_pad(NP) * itemsize)    # out, double-buffered
    vmem_limit = int(min(budget, max(footprint + HEADROOM, 8 << 20)))

    cost = pl.CostEstimate(
        flops=2 * M * H * NP,
        transcendentals=0,
        bytes_accessed=(M * H * itemsize + H * NP * itemsize
                        + NP * 4 + M * NP * itemsize),
    )

    out2d = pl.pallas_call(
        _linear_kernel,
        out_shape=jax.ShapeDtypeStruct((M, NP), x.dtype),
        grid_spec=pltpu.PrefetchScalarGridSpec(
            num_scalar_prefetch=0,
            grid=(grid_m,),
            in_specs=[
                pl.BlockSpec((TM, H), lambda i: (i, 0)),    # streamed x rows
                pl.BlockSpec((H, NP), lambda i: (0, 0)),    # resident weight
                pl.BlockSpec((1, NP), lambda i: (0, 0)),    # resident bias
            ],
            out_specs=pl.BlockSpec((TM, NP), lambda i: (i, 0)),
        ),
        compiler_params=pltpu.CompilerParams(
            dimension_semantics=("parallel",),
            vmem_limit_bytes=vmem_limit,
        ),
        cost_estimate=cost,
    )(x2d, w_p, b_p)

    if lane_dense:
        out2d = out2d[:, :N_OUT]
    return out2d.reshape(B, S, N_OUT)


if __name__ == "__main__":
    batch, seq, hidden = 2, 8, 32

    key = jax.random.PRNGKey(0)
    kx, kw, kb = jax.random.split(key, 3)

    # Deterministic init mimicking nn.Linear's U(-1/sqrt(hidden), 1/sqrt(hidden)).
    bound = 1.0 / (hidden ** 0.5)
    w = jax.random.uniform(kw, (N_OUT, hidden), jnp.float32, -bound, bound)  # torch layout [7, hidden]
    b = jax.random.uniform(kb, (N_OUT,), jnp.float32, -bound, bound)
    w_t = w.T                                                                # [hidden, 7]

    x = jax.random.normal(kx, (batch, seq, hidden), jnp.float32)

    out = jax.block_until_ready(properties_prediction(x, w_t, b))

    # Reference check against plain JAX (same math as torch.nn.Linear forward).
    ref = x @ w_t + b
    assert out.shape == (batch, seq, N_OUT)
    assert jnp.allclose(out, ref, atol=1e-5, rtol=1e-5)

    print("KERNEL_OK")
</pallas_src>

<mosaic_0001>
module attributes {stable_mosaic.version = 11 : i64} {
  func.func @_linear_kernel(%arg0: i32, %arg1: memref<8x32xf32, #tpu.memory_space<vmem>>, %arg2: memref<32x7xf32, #tpu.memory_space<vmem>>, %arg3: memref<1x7xf32, #tpu.memory_space<vmem>>, %arg4: memref<8x7xf32, #tpu.memory_space<vmem>>) attributes {dimension_semantics = [#tpu.dimension_semantics<parallel>], iteration_bounds = array<i64: 2>, scalar_prefetch = 0 : i64, scratch_operands = 0 : i64, tpu.core_type = #tpu.core_type<tc>, window_params = [{transform_indices = @transform_0, window_bounds = array<i64: 8, 32>}, {pipeline_mode = #tpu.pipeline_mode<synchronous>, transform_indices = @transform_1, window_bounds = array<i64: 32, 7>}, {pipeline_mode = #tpu.pipeline_mode<synchronous>, transform_indices = @transform_2, window_bounds = array<i64: 1, 7>}, {transform_indices = @transform_3, window_bounds = array<i64: 8, 7>}]} {
    %c0 = arith.constant 0 : index
    %c0_0 = arith.constant 0 : index
    %0 = vector.load %arg1[%c0, %c0_0] : memref<8x32xf32, #tpu.memory_space<vmem>>, vector<8x32xf32>
    %c0_1 = arith.constant 0 : index
    %c0_2 = arith.constant 0 : index
    %1 = vector.load %arg2[%c0_1, %c0_2] : memref<32x7xf32, #tpu.memory_space<vmem>>, vector<32x7xf32>
    %cst = arith.constant dense<0.000000e+00> : vector<8x7xf32>
    %2 = tpu.matmul %0, %1, %cst {dimension_numbers = #tpu.dot_dimension_numbers<[1], [0], [0], [1], [0, 0, 1, 1], [], []>} : vector<8x32xf32>, vector<32x7xf32>, vector<8x7xf32> -> vector<8x7xf32>
    %c0_3 = arith.constant 0 : index
    %c0_4 = arith.constant 0 : index
    %3 = vector.load %arg3[%c0_3, %c0_4] : memref<1x7xf32, #tpu.memory_space<vmem>>, vector<1x7xf32>
    %4 = vector.broadcast %3 : vector<1x7xf32> to vector<8x7xf32>
    %5 = arith.addf %2, %4 : vector<8x7xf32>
    %c0_5 = arith.constant 0 : index
    %c0_6 = arith.constant 0 : index
    %6 = vector.load %arg4[%c0_5, %c0_6] : memref<8x7xf32, #tpu.memory_space<vmem>>, vector<8x7xf32>
    tpu.vector_store %arg4[%c0_5, %c0_6], %5 {strides = array<i32>} : memref<8x7xf32, #tpu.memory_space<vmem>>, vector<8x7xf32>,
    return
  }
  func.func @transform_0(%arg0: i32) -> (i32, i32) {
    %c0_i32 = arith.constant 0 : i32
    %c0_i32_0 = arith.constant 0 : i32
    return %arg0, %c0_i32 : i32, i32
  }
  func.func @transform_1(%arg0: i32) -> (i32, i32) {
    %c0_i32 = arith.constant 0 : i32
    %c0_i32_0 = arith.constant 0 : i32
    %c0_i32_1 = arith.constant 0 : i32
    return %c0_i32, %c0_i32_0 : i32, i32
  }
  func.func @transform_2(%arg0: i32) -> (i32, i32) {
    %c0_i32 = arith.constant 0 : i32
    %c0_i32_0 = arith.constant 0 : i32
    %c0_i32_1 = arith.constant 0 : i32
    return %c0_i32, %c0_i32_0 : i32, i32
  }
  func.func @transform_3(%arg0: i32) -> (i32, i32) {
    %c0_i32 = arith.constant 0 : i32
    %c0_i32_0 = arith.constant 0 : i32
    return %arg0, %c0_i32 : i32, i32
  }
}

</mosaic_0001>

<bundles_post_ra>
// kernel: tpu_custom_call.1
= control target key start
LH: loop header
LB: loop body
LE: loop exit
PB: predicated region body
PF: predicated region fallthrough
CT: control target
= control target key end

     0   :  { %s301_s12 = smov 0   ;;  %s333_s0 = inlined_call_operand.vmem [shape: f32[16,32], index: 0, kind: input, shape index: {}]   ;;  %s334_s1 = inlined_call_operand.vmem [shape: f32[32,7], index: 1, kind: input, shape index: {}]   ;;  %s335_s2 = inlined_call_operand.vmem [shape: f32[1,7], index: 2, kind: input, shape index: {}]   ;;  %s336_s3 = inlined_call_operand.vmem [shape: f32[16,7], index: 3, kind: output, shape index: {}]  }
   0x1 LB: > { %s254_s13 = sadd.s32 4294967295, %s279_s12   ;;  %p258_p0 = scmp.ge.s32.totalorder %s279_s12, 1  ;;  %s279_s12 = sphi %s301_s12, %s13_s12  }
   0x2   : > { %p136_p1 = scmp.lt.s32.totalorder %s279_s12, 3 }
   0x4   : > { %p137_p2 = pnand %p258_p0, %p136_p1 }
   0x5   : > { %p158_p3 = scmp.lt.s32.totalorder (!%p137_p2), %s254_s13, 1 }
   0x6   : > { %140 = sbr.rel (%p137_p2) target bundleno = 148 (0x94), region = 32 }
   0xb   : > { %v170_v0 = vld [vmem:[%s334_s1 + $0x18] sm:$0xff]  ;;  %v169_v1 = vld [vmem:[%s334_s1 + $0x10] sm:$0xff]  ;;  %v168_v2 = vld [vmem:[%s334_s1 + $0x8] sm:$0xff]  ;;  %s338_s13 = smov (!%p158_p3, %s254_s13), 1  ;;  %vm175_vm0 = vcmask 261120   ;;  %vm199_vm1 = vcmask 56320  }
   0xc   : > { %191 = vmatpush.msra.mxu0 %v170_v0  ;;  %v167_v3 = vld [vmem:[%s334_s1] sm:$0xff]  ;;  %s259_s22 = sshll.u32 %s338_s13, 3 }
   0xd   : > { %s161_s25 = scalar_lea.vmem %s333_s0, %s259_s22  ;;  %v272_v5 = vld [vmem:[%s335_s2] ss:$0 sm:$0xff]  ;;  %s165_s30 = scalar_lea.vmem %s336_s3, %s259_s22 }
   0xe   : > { %192 = vmatpush.msra.mxu0 %v169_v1  ;;  %v166_v4 = vld [vmem:[%s161_s25] sm:$0xff] }
  0x10   : > { %193 = vmatpush.msra.mxu0 %v168_v2 }
  0x12   : > { %194 = vmatpush.msra.mxu0 %v167_v3 }
  0x13   : > { %261 = vmatmul.msk.f32.vlgmr.msra.gmra.mxu0 %vm175_vm0, %v166_v4 }
  0x90   : > { %v196_v6 = vpop.f32.mrf.mxu0 }
  0x91   : > { %v197_v7 = vadd.f32 %v272_v5, %v196_v6 }
  0x93   : > { %200 = vst.msk [vmem:[%s165_s30] sm:$0xff] %vm199_vm1, %v197_v7 }
  0x94 PF: > { %s13_s12 = sadd.s32 1, %s279_s12  }
  0x95   : > { %p10_p4 = scmp.ge.s32.totalorder %s13_s12, 4  }
  0x97   :  { %12 = sbr.rel (!%p10_p4) target bundleno = 1 (0x1), region = 62 }

</bundles_post_ra>
